<compile_context>
chip_gen: v7x
topology: tpu7x:2x2x1
jax: 0.10.0
libtpu: 0.0.40
codegen_flags: <defaults>
</compile_context>

<pallas_src>
import jax
import jax.numpy as jnp
from jax.experimental import pallas as pl
from jax.experimental.pallas import tpu as pltpu

LANE = 128     # TPU lane width; feature dims are padded to multiples of this.
SUBLANE = 8    # batch tiles are padded to multiples of the sublane count.


def _round_up(x, m):
    return (x + m - 1) // m * m


def _cdiv(a, b):
    return -(-a // b)


# --------------------------------------------------------------------------
# Kernel: the whole MLP for one batch tile.  x_ref already holds the packed
# [tile, F+A] (obs ++ actions) slab, so layer 0 is a single MXU matmul.
# --------------------------------------------------------------------------
def _make_mlp_kernel(num_layers, compute_dtype):
    def kernel(x_ref, *refs):
        # refs = (w0, b0, w1, b1, ..., w_last, b_last, out_ref)
        out_ref = refs[-1]
        p = refs[:-1]

        h = x_ref[...].astype(compute_dtype)
        for i in range(num_layers):
            w = p[2 * i][...]
            b = p[2 * i + 1][...].astype(jnp.float32)
            # MXU matmul with f32 accumulation; bias add stays f32 (VPU).
            h = jnp.dot(h, w, preferred_element_type=jnp.float32) + b
            if i < num_layers - 1:
                # ReLU on hidden layers only, then cast for the next matmul.
                h = jnp.maximum(h, 0.0).astype(compute_dtype)

        out_ref[...] = h.astype(out_ref.dtype)

    return kernel


# --------------------------------------------------------------------------
# One-time parameter preparation: zero-pad all output widths (and matching
# input rows) to multiples of 128 lanes, cast weights to the MXU compute
# dtype (bf16 by default, MXU-native on v5e/v6e/v7x).  Biases stay f32.
# Zero padding is numerically exact: ReLU(0) = 0 and zero weights/rows
# contribute nothing.
# --------------------------------------------------------------------------
def prepare_params(params, in_features, in_actions, *,
                   compute_dtype=jnp.bfloat16):
    num_layers = len(params)
    assert params[0][0].shape[0] == in_features + in_actions

    flat = []
    prev = in_features + in_actions
    prev_pad = prev  # layer-0 input width stays F+A (matches the packed slab)
    for w, b in params:
        d_in, d_out = w.shape
        assert d_in == prev
        d_out_pad = _round_up(d_out, LANE)
        wp = jnp.zeros((prev_pad, d_out_pad), jnp.float32)
        wp = wp.at[:d_in, :d_out].set(w.astype(jnp.float32))
        bp = jnp.zeros((1, d_out_pad), jnp.float32)
        bp = bp.at[0, :d_out].set(b.astype(jnp.float32))
        flat.append(wp.astype(compute_dtype))
        flat.append(bp)  # bias kept in f32
        prev, prev_pad = d_out, d_out_pad

    return {
        "flat": flat,
        "num_layers": num_layers,
        "out_dim": prev,            # real num_quantiles
        "out_dim_padded": prev_pad,
        "compute_dtype": compute_dtype,
    }


# --------------------------------------------------------------------------
# Wrapper: batch-tiled pallas_call.
#   batch_tile     : max rows per grid step (default 1024; sweep 512-2048).
#   min_grid_steps : force >=N grid steps when B is large enough so v7x's two
#                    TensorCores both get work (harmless on v5e/v6e).
#   out_dtype      : set jnp.bfloat16 to halve output HBM bytes if downstream
#                    tolerates it.
#   return_padded  : return the lane-dense [B_pad, q_pad] slab directly and
#                    skip the wrapper slice copy.
#   vmem_limit_bytes: 32 MiB is safe on every generation; raise to 64-96 MiB
#                    on v5e/v6e (128 MiB physical VMEM) for bigger sweeps.
# --------------------------------------------------------------------------
def state_action_to_q_quantiles(obs, actions, prepared, *,
                                batch_tile=1024,
                                min_grid_steps=2,
                                out_dtype=jnp.float32,
                                return_padded=False,
                                vmem_limit_bytes=32 * 1024 * 1024):
    assert obs.shape[0] == actions.shape[0]
    B = obs.shape[0]

    flat = prepared["flat"]
    num_layers = prepared["num_layers"]
    q = prepared["out_dim"]
    q_pad = prepared["out_dim_padded"]
    compute_dtype = prepared["compute_dtype"]

    # Pack obs ++ actions once in the wrapper (tiny [B, F+A] slab) so layer 0
    # is a single matmul inside the kernel.
    x = jnp.concatenate([obs, actions], axis=1)
    FA = x.shape[1]

    # Balanced batch tiling: keep padding to at most one sublane group per
    # tile, and (optionally) guarantee >= min_grid_steps steps so the
    # "parallel" batch axis can shard across v7x's two TensorCores.
    n_tiles = max(1, _cdiv(B, batch_tile))
    if min_grid_steps > 1 and B >= min_grid_steps * 256:
        n_tiles = max(n_tiles, min_grid_steps)
    tile = _round_up(_cdiv(B, n_tiles), SUBLANE)
    b_pad = n_tiles * tile
    if b_pad != B:
        x = jnp.pad(x, ((0, b_pad - B), (0, 0)))

    in_specs = [pl.BlockSpec((tile, FA), lambda i: (i, 0))]
    for p in flat:
        # Weights/biases are grid-invariant: full block, constant index map,
        # single-buffered so their VMEM footprint is not doubled.
        in_specs.append(
            pl.BlockSpec(p.shape, lambda i: (0, 0),
                         pipeline_mode=pl.Buffered(1)))

    out_spec = pl.BlockSpec((tile, q_pad), lambda i: (i, 0))

    kernel = _make_mlp_kernel(num_layers, compute_dtype)

    out_padded = pl.pallas_call(
        kernel,
        out_shape=jax.ShapeDtypeStruct((b_pad, q_pad), out_dtype),
        grid_spec=pltpu.PrefetchScalarGridSpec(
            num_scalar_prefetch=0,
            grid=(n_tiles,),
            in_specs=in_specs,
            out_specs=out_spec,
        ),
        compiler_params=pltpu.CompilerParams(
            dimension_semantics=("parallel",),
            vmem_limit_bytes=vmem_limit_bytes,
        ),
    )(x, *flat)

    if return_padded:
        # NOTE: padded batch rows / lane columns beyond (B, q) hold garbage
        # (bias-driven values); only consume [:B, :q].
        return out_padded
    return out_padded[:B, :q]


# --------------------------------------------------------------------------
# Deterministic parameter init mimicking PyTorch nn.Linear default:
# U(-k, k), k = 1/sqrt(fan_in).  Weights stored as [in, out] (transposed).
# --------------------------------------------------------------------------
def init_params(key, in_features, in_actions, layers_critic, num_quantiles):
    dims = [in_features + in_actions] + list(layers_critic) + [num_quantiles]
    params = []
    for i in range(len(dims) - 1):
        d_in, d_out = dims[i], dims[i + 1]
        key, kw, kb = jax.random.split(key, 3)
        bound = 1.0 / (d_in ** 0.5)
        w = jax.random.uniform(kw, (d_in, d_out), jnp.float32, -bound, bound)
        b = jax.random.uniform(kb, (d_out,), jnp.float32, -bound, bound)
        params.append((w, b))
    return params


# --------------------------------------------------------------------------
# Pure-JAX reference (mirrors the PyTorch forward).
# --------------------------------------------------------------------------
def reference_forward(obs, actions, params):
    h = jnp.concatenate([obs, actions], axis=1)
    for i, (w, b) in enumerate(params):
        h = h @ w + b
        if i < len(params) - 1:
            h = jnp.maximum(h, 0.0)
    return h


if __name__ == "__main__":
    # Small shapes consistent with the module's forward.
    BATCH = 16
    IN_FEATURES = 24          # obs dim
    IN_ACTIONS = 8            # action dim
    LAYERS_CRITIC = (32, 64)  # hidden layer sizes
    NUM_QUANTILES = 25        # len(quantiles)

    key = jax.random.PRNGKey(0)
    k_obs, k_act, k_params = jax.random.split(key, 3)

    obs = jax.random.normal(k_obs, (BATCH, IN_FEATURES), jnp.float32)
    actions = jax.random.normal(k_act, (BATCH, IN_ACTIONS), jnp.float32)
    params = init_params(k_params, IN_FEATURES, IN_ACTIONS,
                         LAYERS_CRITIC, NUM_QUANTILES)

    ref = reference_forward(obs, actions, params)

    # Full-precision path: tight check vs reference.
    prepped_f32 = prepare_params(params, IN_FEATURES, IN_ACTIONS,
                                 compute_dtype=jnp.float32)
    out_f32 = jax.block_until_ready(
        state_action_to_q_quantiles(obs, actions, prepped_f32))
    assert out_f32.shape == (BATCH, NUM_QUANTILES), out_f32.shape
    assert jnp.allclose(out_f32, ref, atol=5e-4, rtol=5e-4), \
        "f32 kernel mismatch vs reference"

    # bf16-MXU path (recommended production setting on v5e/v6e/v7x):
    # loose check vs f32 reference (activations also travel in bf16).
    prepped_bf16 = prepare_params(params, IN_FEATURES, IN_ACTIONS,
                                  compute_dtype=jnp.bfloat16)
    out_bf16 = jax.block_until_ready(
        state_action_to_q_quantiles(obs, actions, prepped_bf16))
    assert out_bf16.shape == (BATCH, NUM_QUANTILES), out_bf16.shape
    assert jnp.allclose(out_bf16, ref, atol=5e-2, rtol=5e-2), \
        "bf16 kernel mismatch vs reference"

    print("KERNEL_OK")
</pallas_src>

<mosaic_0001>
module attributes {stable_mosaic.version = 11 : i64} {
  func.func @kernel(%arg0: i32, %arg1: memref<16x32xf32, #tpu.memory_space<vmem>>, %arg2: memref<32x128xf32, #tpu.memory_space<vmem>>, %arg3: memref<1x128xf32, #tpu.memory_space<vmem>>, %arg4: memref<128x128xf32, #tpu.memory_space<vmem>>, %arg5: memref<1x128xf32, #tpu.memory_space<vmem>>, %arg6: memref<128x128xf32, #tpu.memory_space<vmem>>, %arg7: memref<1x128xf32, #tpu.memory_space<vmem>>, %arg8: memref<16x128xf32, #tpu.memory_space<vmem>>) attributes {dimension_semantics = [#tpu.dimension_semantics<parallel>], iteration_bounds = array<i64: 1>, scalar_prefetch = 0 : i64, scratch_operands = 0 : i64, tpu.core_type = #tpu.core_type<tc>, window_params = [{transform_indices = @transform_0, window_bounds = array<i64: 16, 32>}, {pipeline_mode = #tpu.pipeline_mode<synchronous>, transform_indices = @transform_1, window_bounds = array<i64: 32, 128>}, {pipeline_mode = #tpu.pipeline_mode<synchronous>, transform_indices = @transform_2, window_bounds = array<i64: 1, 128>}, {pipeline_mode = #tpu.pipeline_mode<synchronous>, transform_indices = @transform_3, window_bounds = array<i64: 128, 128>}, {pipeline_mode = #tpu.pipeline_mode<synchronous>, transform_indices = @transform_4, window_bounds = array<i64: 1, 128>}, {pipeline_mode = #tpu.pipeline_mode<synchronous>, transform_indices = @transform_5, window_bounds = array<i64: 128, 128>}, {pipeline_mode = #tpu.pipeline_mode<synchronous>, transform_indices = @transform_6, window_bounds = array<i64: 1, 128>}, {transform_indices = @transform_7, window_bounds = array<i64: 16, 128>}]} {
    %c0 = arith.constant 0 : index
    %c0_0 = arith.constant 0 : index
    %0 = vector.load %arg1[%c0, %c0_0] : memref<16x32xf32, #tpu.memory_space<vmem>>, vector<16x32xf32>
    %c0_1 = arith.constant 0 : index
    %c0_2 = arith.constant 0 : index
    %1 = vector.load %arg2[%c0_1, %c0_2] : memref<32x128xf32, #tpu.memory_space<vmem>>, vector<32x128xf32>
    %c0_3 = arith.constant 0 : index
    %c0_4 = arith.constant 0 : index
    %2 = vector.load %arg3[%c0_3, %c0_4] : memref<1x128xf32, #tpu.memory_space<vmem>>, vector<1x128xf32>
    %cst = arith.constant dense<0.000000e+00> : vector<16x128xf32>
    %3 = tpu.matmul %0, %1, %cst {dimension_numbers = #tpu.dot_dimension_numbers<[1], [0], [0], [1], [0, 0, 1, 1], [], []>} : vector<16x32xf32>, vector<32x128xf32>, vector<16x128xf32> -> vector<16x128xf32>
    %4 = vector.broadcast %2 : vector<1x128xf32> to vector<16x128xf32>
    %5 = arith.addf %3, %4 : vector<16x128xf32>
    %cst_5 = arith.constant 0.000000e+00 : f32
    %6 = vector.broadcast %cst_5 : f32 to vector<16x128xf32>
    %7 = arith.maximumf %5, %6 : vector<16x128xf32>
    %c0_6 = arith.constant 0 : index
    %c0_7 = arith.constant 0 : index
    %8 = vector.load %arg4[%c0_6, %c0_7] : memref<128x128xf32, #tpu.memory_space<vmem>>, vector<128x128xf32>
    %c0_8 = arith.constant 0 : index
    %c0_9 = arith.constant 0 : index
    %9 = vector.load %arg5[%c0_8, %c0_9] : memref<1x128xf32, #tpu.memory_space<vmem>>, vector<1x128xf32>
    %cst_10 = arith.constant dense<0.000000e+00> : vector<16x128xf32>
    %10 = tpu.matmul %7, %8, %cst_10 {dimension_numbers = #tpu.dot_dimension_numbers<[1], [0], [0], [1], [0, 0, 1, 1], [], []>} : vector<16x128xf32>, vector<128x128xf32>, vector<16x128xf32> -> vector<16x128xf32>
    %11 = vector.broadcast %9 : vector<1x128xf32> to vector<16x128xf32>
    %12 = arith.addf %10, %11 : vector<16x128xf32>
    %cst_11 = arith.constant 0.000000e+00 : f32
    %13 = vector.broadcast %cst_11 : f32 to vector<16x128xf32>
    %14 = arith.maximumf %12, %13 : vector<16x128xf32>
    %c0_12 = arith.constant 0 : index
    %c0_13 = arith.constant 0 : index
    %15 = vector.load %arg6[%c0_12, %c0_13] : memref<128x128xf32, #tpu.memory_space<vmem>>, vector<128x128xf32>
    %c0_14 = arith.constant 0 : index
    %c0_15 = arith.constant 0 : index
    %16 = vector.load %arg7[%c0_14, %c0_15] : memref<1x128xf32, #tpu.memory_space<vmem>>, vector<1x128xf32>
    %cst_16 = arith.constant dense<0.000000e+00> : vector<16x128xf32>
    %17 = tpu.matmul %14, %15, %cst_16 {dimension_numbers = #tpu.dot_dimension_numbers<[1], [0], [0], [1], [0, 0, 1, 1], [], []>} : vector<16x128xf32>, vector<128x128xf32>, vector<16x128xf32> -> vector<16x128xf32>
    %18 = vector.broadcast %16 : vector<1x128xf32> to vector<16x128xf32>
    %19 = arith.addf %17, %18 : vector<16x128xf32>
    %c0_17 = arith.constant 0 : index
    %c0_18 = arith.constant 0 : index
    %20 = vector.load %arg8[%c0_17, %c0_18] : memref<16x128xf32, #tpu.memory_space<vmem>>, vector<16x128xf32>
    tpu.vector_store %arg8[%c0_17, %c0_18], %19 {strides = array<i32>} : memref<16x128xf32, #tpu.memory_space<vmem>>, vector<16x128xf32>,
    return
  }
  func.func @transform_0(%arg0: i32) -> (i32, i32) {
    %c0_i32 = arith.constant 0 : i32
    %c0_i32_0 = arith.constant 0 : i32
    return %arg0, %c0_i32 : i32, i32
  }
  func.func @transform_1(%arg0: i32) -> (i32, i32) {
    %c0_i32 = arith.constant 0 : i32
    %c0_i32_0 = arith.constant 0 : i32
    %c0_i32_1 = arith.constant 0 : i32
    return %c0_i32, %c0_i32_0 : i32, i32
  }
  func.func @transform_2(%arg0: i32) -> (i32, i32) {
    %c0_i32 = arith.constant 0 : i32
    %c0_i32_0 = arith.constant 0 : i32
    %c0_i32_1 = arith.constant 0 : i32
    return %c0_i32, %c0_i32_0 : i32, i32
  }
  func.func @transform_3(%arg0: i32) -> (i32, i32) {
    %c0_i32 = arith.constant 0 : i32
    %c0_i32_0 = arith.constant 0 : i32
    %c0_i32_1 = arith.constant 0 : i32
    return %c0_i32, %c0_i32_0 : i32, i32
  }
  func.func @transform_4(%arg0: i32) -> (i32, i32) {
    %c0_i32 = arith.constant 0 : i32
    %c0_i32_0 = arith.constant 0 : i32
    %c0_i32_1 = arith.constant 0 : i32
    return %c0_i32, %c0_i32_0 : i32, i32
  }
  func.func @transform_5(%arg0: i32) -> (i32, i32) {
    %c0_i32 = arith.constant 0 : i32
    %c0_i32_0 = arith.constant 0 : i32
    %c0_i32_1 = arith.constant 0 : i32
    return %c0_i32, %c0_i32_0 : i32, i32
  }
  func.func @transform_6(%arg0: i32) -> (i32, i32) {
    %c0_i32 = arith.constant 0 : i32
    %c0_i32_0 = arith.constant 0 : i32
    %c0_i32_1 = arith.constant 0 : i32
    return %c0_i32, %c0_i32_0 : i32, i32
  }
  func.func @transform_7(%arg0: i32) -> (i32, i32) {
    %c0_i32 = arith.constant 0 : i32
    %c0_i32_0 = arith.constant 0 : i32
    return %arg0, %c0_i32 : i32, i32
  }
}

</mosaic_0001>

<bundles_post_ra>
// kernel: tpu_custom_call.1
= control target key start
LH: loop header
LB: loop body
LE: loop exit
PB: predicated region body
PF: predicated region fallthrough
CT: control target
= control target key end

     0   :  { %12 = vsyncpa [#allocation3], 0  ;;  %s870_s0 = inlined_call_operand.hbm [shape: f32[16,32], index: 0, kind: input, shape index: {}]   ;;  %s871_s1 = inlined_call_operand.hbm [shape: f32[32,128], index: 1, kind: input, shape index: {}]   ;;  %s872_s2 = inlined_call_operand.vmem [shape: f32[1,128], index: 2, kind: input, shape index: {}]   ;;  %s873_s3 = inlined_call_operand.hbm [shape: f32[128,128], index: 3, kind: input, shape index: {}]   ;;  %s874_s4 = inlined_call_operand.vmem [shape: f32[1,128], index: 4, kind: input, shape index: {}]   ;;  %s875_s5 = inlined_call_operand.hbm [shape: f32[128,128], index: 5, kind: input, shape index: {}]   ;;  %s876_s6 = inlined_call_operand.vmem [shape: f32[1,128], index: 6, kind: input, shape index: {}]   ;;  %s877_s7 = inlined_call_operand.hbm [shape: f32[16,128], index: 7, kind: output, shape index: {}]  }
   0x1   :  { %13 = vsyncpa [#allocation6], 0 }
   0x2   :  { %14 = vsyncpa [#allocation9], 0 }
   0x3   :  { %15 = vsyncpa [#allocation4], 0  ;;  %s723_s24 = smov [#allocation5]   ;;  %s724_s26 = smov [#allocation2]  }
   0x4   :  { %s33_s25 = sshll.u32 %s723_s24, 4  ;;  %s21_s27 = sshll.u32 %s724_s26, 4  ;;  %s34_s25 = int_to_ptr.vmem [resolvable:$true] %s33_s25  ;;  %s770_s27 = int_to_ptr.vmem [resolvable:$true] %s21_s27 }
   0x5   :  { %s605_s30 = scalar_lea.hbm %s871_s1, 512 }
   0x6   :  { %p606_p0 = scmp.ne.s32.totalorder %s871_s1, %s605_s30  ;;  %p609_p1 = scmp.lt.u32.totalorder %s605_s30, %s871_s1 }
   0x8   :  { %p611_p2 = pnand %p609_p1, %p606_p0 }
   0xa   :  { %614 = shalt.err (!%p611_p2)
}
   0xb   :  { %s615_s12 = scalar_lea.vmem %s34_s25, 512  ;;  %p620_p4 = scmp.lt.s32.totalorder %s34_s25, %s34_s25 }
   0xc   :  { %p616_p3 = scmp.ne.s32.totalorder %s34_s25, %s615_s12  ;;  %p621_p5 = scmp.lt.s32.totalorder %s615_s12, %s615_s12 }
   0xe   :  { %p622_p6 = por %p621_p5, %p620_p4 }
  0x10   :  { %p623_p7 = pnand %p622_p6, %p616_p3 }
  0x12   :  { %626 = shalt.err (!%p623_p7)
}
  0x13   :  { %s725_s13 = smov 128   ;;  %s726_s14 = smov 8  }
  0x14   :  { %39 = dma.hbm_to_vmem [thread:$0]  %s871_s1, 512, %s34_s25, [#allocation6], %s725_s13, %s725_s13, %s726_s14  }
  0x15   :  { %s627_s19 = scalar_lea.hbm %s870_s0, 256 }
  0x16   :  { %p628_p8 = scmp.ne.s32.totalorder %s870_s0, %s627_s19  ;;  %p631_p9 = scmp.lt.u32.totalorder %s627_s19, %s870_s0 }
  0x18   :  { %p633_p10 = pnand %p631_p9, %p628_p8 }
  0x1a   :  { %636 = shalt.err (!%p633_p10)
}
  0x1b   :  { %s637_s24 = scalar_lea.vmem %s770_s27, 256  ;;  %p642_p12 = scmp.lt.s32.totalorder %s770_s27, %s770_s27 }
  0x1c   :  { %p638_p11 = scmp.ne.s32.totalorder %s770_s27, %s637_s24  ;;  %p643_p13 = scmp.lt.s32.totalorder %s637_s24, %s637_s24 }
  0x1e   :  { %p644_p0 = por %p643_p13, %p642_p12 }
  0x20   :  { %p645_p1 = pnand %p644_p0, %p638_p11 }
  0x22   :  { %648 = shalt.err (!%p645_p1)
}
  0x23   :  { %27 = dma.hbm_to_vmem [thread:$0]  %s870_s0, 256, %s770_s27, [#allocation3], %s725_s13, %s725_s13, %s726_s14  }
  0x24   :  { %s727_s26 = smov [#allocation7]   ;;  %s728_s29 = smov [#allocation8]  }
  0x25   :  { %s47_s28 = sshll.u32 %s727_s26, 4  ;;  %s61_s30 = sshll.u32 %s728_s29, 4  ;;  %s48_s28 = int_to_ptr.vmem [resolvable:$true] %s47_s28  ;;  %s807_s30 = int_to_ptr.vmem [resolvable:$true] %s61_s30 }
  0x26   :  { %s649_s10 = scalar_lea.hbm %s873_s3, 2048 }
  0x27   :  { %p650_p2 = scmp.ne.s32.totalorder %s873_s3, %s649_s10  ;;  %p653_p3 = scmp.lt.u32.totalorder %s649_s10, %s873_s3 }
  0x29   :  { %p655_p4 = pnand %p653_p3, %p650_p2 }
  0x2b   :  { %658 = shalt.err (!%p655_p4)
}
  0x2c   :  { %s659_s0 = scalar_lea.vmem %s48_s28, 2048  ;;  %p664_p6 = scmp.lt.s32.totalorder %s48_s28, %s48_s28 }
  0x2d   :  { %p660_p5 = scmp.ne.s32.totalorder %s48_s28, %s659_s0  ;;  %p665_p7 = scmp.lt.s32.totalorder %s659_s0, %s659_s0 }
  0x2f   :  { %p666_p8 = por %p665_p7, %p664_p6 }
  0x31   :  { %p667_p9 = pnand %p666_p8, %p660_p5 }
  0x33   :  { %670 = shalt.err (!%p667_p9)
}
  0x34   :  { %53 = dma.hbm_to_vmem [thread:$0]  %s873_s3, 2048, %s48_s28, [#allocation6], %s725_s13, %s725_s13, %s726_s14  }
  0x35   :  { %s671_s20 = scalar_lea.hbm %s875_s5, 2048 }
  0x36   :  { %p672_p10 = scmp.ne.s32.totalorder %s875_s5, %s671_s20  ;;  %p675_p11 = scmp.lt.u32.totalorder %s671_s20, %s875_s5 }
  0x38   :  { %p677_p12 = pnand %p675_p11, %p672_p10 }
  0x3a   :  { %680 = shalt.err (!%p677_p12)
}
  0x3b   :  { %s681_s1 = scalar_lea.vmem %s807_s30, 2048  ;;  %p686_p0 = scmp.lt.s32.totalorder %s807_s30, %s807_s30 }
  0x3c   :  { %p682_p13 = scmp.ne.s32.totalorder %s807_s30, %s681_s1  ;;  %p687_p1 = scmp.lt.s32.totalorder %s681_s1, %s681_s1 }
  0x3e   :  { %p688_p2 = por %p687_p1, %p686_p0 }
  0x40   :  { %p689_p3 = pnand %p688_p2, %p682_p13 }
  0x42   :  { %692 = shalt.err (!%p689_p3)
}
  0x43   :  { %67 = dma.hbm_to_vmem [thread:$0]  %s875_s5, 2048, %s807_s30, [#allocation9], %s725_s13, %s725_s13, %s726_s14  }
  0x44   :  { %715 = dma.done.wait [#allocation3], 256  }
  0x45   :  { %716 = vsyncadd [#allocation3], 4294967040 }
  0x46   :  { %717 = dma.done.wait [#allocation6], 2560  }
  0x47   :  { %718 = vsyncadd [#allocation6], 4294964736 }
  0x48   :  { %719 = dma.done.wait [#allocation9], 2048  }
  0x49   :  { %720 = vsyncadd [#allocation9], 4294965248  ;;  %vm95_vm0 = vcmask 261120   ;;  %v84_v0 = vld [vmem:[#allocation5] sm:$0xff]  ;;  %v85_v1 = vld [vmem:[#allocation5 + $0x8] sm:$0xff]  ;;  %s729_s8 = smov [#allocation10]  }
  0x4a   :  { %v86_v2 = vld [vmem:[#allocation5 + $0x10] sm:$0xff]  ;;  %v526_v3 = vpack.c.bf16 %v85_v1, %v84_v0  ;;  %v87_v4 = vld [vmem:[#allocation5 + $0x18] sm:$0xff]  ;;  %v179_v7 = vld [vmem:[#allocation7] sm:$0xff]  ;;  %s384_s9 = sshll.u32 %s729_s8, 4  ;;  %s385_s9 = int_to_ptr.vmem [resolvable:$true] %s384_s9 }
  0x4b   :  { %v82_v5 = vld [vmem:[#allocation2] sm:$0xff]  ;;  %v530_v6 = vpack.c.bf16 %v87_v4, %v86_v2  ;;  %v180_v8 = vld [vmem:[#allocation7 + $0x8] sm:$0xff]  ;;  %v182_v11 = vld [vmem:[#allocation7 + $0x18] sm:$0xff]  ;;  %p698_p5 = scmp.lt.s32.totalorder %s385_s9, %s385_s9 }
  0x4c   :  { %453 = vmatprep.mubr.msk.f32.mxu0 %vm95_vm0, %v82_v5  ;;  %v181_v9 = vld [vmem:[#allocation7 + $0x10] sm:$0xff]  ;;  %527 = vmatprep.subr.bf16.mxu0 %v526_v3  ;;  %v534_v10 = vpack.c.bf16 %v180_v8, %v179_v7  ;;  %v183_v13 = vld [vmem:[#allocation7 + $0x20] sm:$0xff]  ;;  %v184_v14 = vld [vmem:[#allocation7 + $0x28] sm:$0xff] }
  0x4d   :  { %529 = vmatpush3.bf16.msra.mxu0 %v526_v3  ;;  %v538_v12 = vpack.c.bf16 %v182_v11, %v181_v9  ;;  %v542_v15 = vpack.c.bf16 %v184_v14, %v183_v13  ;;  %v83_v16 = vld [vmem:[#allocation2 + $0x8] sm:$0xff]  ;;  %v185_v17 = vld [vmem:[#allocation7 + $0x30] sm:$0xff]  ;;  %v187_v20 = vld [vmem:[#allocation7 + $0x40] sm:$0xff] }
  0x4e   :  { %531 = vmatprep.subr.bf16.mxu0 %v530_v6  ;;  %535 = vmatprep.subr.bf16.mxu1 %v534_v10  ;;  %v186_v18 = vld [vmem:[#allocation7 + $0x38] sm:$0xff]  ;;  %v188_v21 = vld [vmem:[#allocation7 + $0x48] sm:$0xff]  ;;  %v189_v23 = vld [vmem:[#allocation7 + $0x50] sm:$0xff] }
  0x4f   :  { %537 = vmatpush3.bf16.msra.mxu1 %v534_v10  ;;  %v546_v19 = vpack.c.bf16 %v186_v18, %v185_v17  ;;  %v550_v22 = vpack.c.bf16 %v188_v21, %v187_v20  ;;  %v190_v24 = vld [vmem:[#allocation7 + $0x58] sm:$0xff]  ;;  %v191_v26 = vld [vmem:[#allocation7 + $0x60] sm:$0xff]  ;;  %v192_v27 = vld [vmem:[#allocation7 + $0x68] sm:$0xff] }
  0x50   :  { %539 = vmatprep.subr.bf16.mxu1 %v538_v12  ;;  %v554_v25 = vpack.c.bf16 %v190_v24, %v189_v23  ;;  %v558_v28 = vpack.c.bf16 %v192_v27, %v191_v26  ;;  %v193_v29 = vld [vmem:[#allocation7 + $0x70] sm:$0xff]  ;;  %v194_v30 = vld [vmem:[#allocation7 + $0x78] sm:$0xff]  ;;  %v279_v32 = vld [vmem:[#allocation8] sm:$0xff] }
  0x51   :  { %533 = vmatpush3.bf16.msra.mxu0 %v530_v6  ;;  %v562_v31 = vpack.c.bf16 %v194_v30, %v193_v29  ;;  %v280_v33 = vld [vmem:[#allocation8 + $0x8] sm:$0xff]  ;;  %v281_v34 = vld [vmem:[#allocation8 + $0x10] sm:$0xff]  ;;  %v282_v36 = vld [vmem:[#allocation8 + $0x18] sm:$0xff] }
  0x52   :  { %v566_v35 = vpack.c.bf16 %v280_v33, %v279_v32  ;;  %v570_v37 = vpack.c.bf16 %v282_v36, %v281_v34  ;;  %v283_v38 = vld [vmem:[#allocation8 + $0x20] sm:$0xff]  ;;  %v284_v39 = vld [vmem:[#allocation8 + $0x28] sm:$0xff]  ;;  %v285_v41 = vld [vmem:[#allocation8 + $0x30] sm:$0xff] }
  0x53   :  { %541 = vmatpush3.bf16.msra.mxu1 %v538_v12  ;;  %v574_v40 = vpack.c.bf16 %v284_v39, %v283_v38  ;;  %v286_v42 = vld [vmem:[#allocation8 + $0x38] sm:$0xff]  ;;  %v287_v44 = vld [vmem:[#allocation8 + $0x40] sm:$0xff]  ;;  %v288_v45 = vld [vmem:[#allocation8 + $0x48] sm:$0xff] }
  0x54   :  { %454 = vmatmul.mubr.msk.f32.vlgmr.msra.gmra.mrb[0].mxu0 %vm95_vm0, %v83_v16  ;;  %543 = vmatprep.subr.bf16.mxu1 %v542_v15  ;;  %v578_v43 = vpack.c.bf16 %v286_v42, %v285_v41  ;;  %v582_v46 = vpack.c.bf16 %v288_v45, %v287_v44  ;;  %v289_v47 = vld [vmem:[#allocation8 + $0x50] sm:$0xff]  ;;  %v290_v48 = vld [vmem:[#allocation8 + $0x58] sm:$0xff]  ;;  %v291_v50 = vld [vmem:[#allocation8 + $0x60] sm:$0xff] }
  0x55   :  { %567 = vmatprep.subr.bf16.mxu0 %v566_v35  ;;  %v586_v49 = vpack.c.bf16 %v290_v48, %v289_v47  ;;  %v292_v51 = vld [vmem:[#allocation8 + $0x68] sm:$0xff]  ;;  %v398_v53 = vld [vmem:[%s872_s2] ss:$0 sm:$0xff]  ;;  %v294_v61 = vld [vmem:[#allocation8 + $0x78] sm:$0xff] }
  0x56   :  { %569 = vmatpush3.bf16.msra.mxu0 %v566_v35  ;;  %v590_v52 = vpack.c.bf16 %v292_v51, %v291_v50  ;;  %v293_v60 = vld [vmem:[#allocation8 + $0x70] sm:$0xff] }
  0x57   :  { %545 = vmatpush3.bf16.msra.mxu1 %v542_v15  ;;  %571 = vmatprep.subr.bf16.mxu0 %v570_v37  ;;  %v594_v62 = vpack.c.bf16 %v294_v61, %v293_v60  ;;  %v401_v63 = vld [vmem:[%s874_s4] ss:$0 sm:$0xff]  ;;  %s693_s4 = scalar_lea.vmem %s385_s9, 256 }
  0x58   :  { %547 = vmatprep.subr.bf16.mxu1 %v546_v19  ;;  %v402_v6 = vld [vmem:[%s876_s6] ss:$0 sm:$0xff]  ;;  %p694_p4 = scmp.ne.s32.totalorder %s385_s9, %s693_s4  ;;  %p699_p6 = scmp.lt.s32.totalorder %s693_s4, %s693_s4 }
  0x5a   :  { %573 = vmatpush3.bf16.msra.mxu0 %v570_v37  ;;  %p700_p7 = por %p699_p6, %p698_p5 }
  0x5b   :  { %549 = vmatpush3.bf16.msra.mxu1 %v546_v19  ;;  %575 = vmatprep.subr.bf16.mxu0 %v574_v40 }
  0x5c   :  { %551 = vmatprep.subr.bf16.mxu1 %v550_v22  ;;  %p701_p8 = pnand %p700_p7, %p694_p4 }
  0x5e   :  { %577 = vmatpush3.bf16.msra.mxu0 %v574_v40 }
  0x5f   :  { %553 = vmatpush3.bf16.msra.mxu1 %v550_v22  ;;  %579 = vmatprep.subr.bf16.mxu0 %v578_v43 }
  0x60   :  { %555 = vmatprep.subr.bf16.mxu1 %v554_v25 }
  0x62   :  { %581 = vmatpush3.bf16.msra.mxu0 %v578_v43 }
  0x63   :  { %557 = vmatpush3.bf16.msra.mxu1 %v554_v25  ;;  %583 = vmatprep.subr.bf16.mxu0 %v582_v46 }
  0x64   :  { %559 = vmatprep.subr.bf16.mxu1 %v558_v28 }
  0x66   :  { %585 = vmatpush3.bf16.msra.mxu0 %v582_v46 }
  0x67   :  { %561 = vmatpush3.bf16.msra.mxu1 %v558_v28  ;;  %587 = vmatprep.subr.bf16.mxu0 %v586_v49 }
  0x68   :  { %563 = vmatprep.subr.bf16.mxu1 %v562_v31 }
  0x6a   :  { %589 = vmatpush3.bf16.msra.mxu0 %v586_v49 }
  0x6b   :  { %565 = vmatpush3.bf16.msra.mxu1 %v562_v31  ;;  %591 = vmatprep.subr.bf16.mxu0 %v590_v52 }
  0x6e   :  { %593 = vmatpush3.bf16.msra.mxu0 %v590_v52 }
  0x6f   :  { %595 = vmatprep.subr.bf16.mxu0 %v594_v62 }
  0x72   :  { %597 = vmatpush3.bf16.msra.mxu0 %v594_v62 }
 0x127   :  { %v455_v54 = vpop.f32.mrb[0].mxu0 }
 0x128   :  { %v174_v55 = vadd.f32 %v455_v54, %v398_v53  ;;  %v168_v56 = vpop.f32.mrb[1].mxu0 }
 0x129   :  { %v169_v57 = vadd.f32 %v398_v53, %v168_v56 }
 0x12a   :  { %v178_v59 = vmax.f32 %v174_v55, 0.0 }
 0x12b   :  { %v177_v58 = vmax.f32 %v169_v57, 0.0 }
 0x12d   :  { %488 = vmatprep.mubr.f32.mxu1 %v177_v58 }
 0x12e   :  { %489 = vmatmul.mubr.f32.vlgmr.msra.gmra.mrb[0].mxu1 %v178_v59 }
 0x201   :  { %v490_v0 = vpop.f32.mrb[0].mxu1 }
 0x202   :  { %v274_v1 = vadd.f32 %v490_v0, %v401_v63  ;;  %v268_v2 = vpop.f32.mrb[1].mxu1 }
 0x203   :  { %v269_v3 = vadd.f32 %v401_v63, %v268_v2 }
 0x204   :  { %v278_v5 = vmax.f32 %v274_v1, 0.0 }
 0x205   :  { %v277_v4 = vmax.f32 %v269_v3, 0.0 }
 0x207   :  { %523 = vmatprep.mubr.f32.mxu0 %v277_v4 }
 0x208   :  { %524 = vmatmul.mubr.f32.vlgmr.msra.gmra.mrb[2].mxu0 %v278_v5 }
 0x2db   :  { %v525_v7 = vpop.f32.mrb[2].mxu0 }
 0x2dc   :  { %v374_v8 = vadd.f32 %v525_v7, %v402_v6  ;;  %v368_v9 = vpop.f32.mrb[3].mxu0 }
 0x2dd   :  { %v369_v10 = vadd.f32 %v402_v6, %v368_v9 }
 0x2de   :  { %378 = vst [vmem:[#allocation10 + $0x8] sm:$0xff] %v374_v8 }
 0x2df   :  { %377 = vst [vmem:[#allocation10] sm:$0xff] %v369_v10 }
 0x2e0   :  { %704 = shalt.err (!%p701_p8)
}
 0x2e1   :  { %s705_s6 = scalar_lea.hbm %s877_s7, 256 }
 0x2e2   :  { %p706_p9 = scmp.ne.s32.totalorder %s877_s7, %s705_s6  ;;  %p709_p10 = scmp.lt.u32.totalorder %s705_s6, %s877_s7 }
 0x2e4   :  { %p711_p11 = pnand %p709_p10, %p706_p9 }
 0x2e6   :  { %714 = shalt.err (!%p711_p11)
}
 0x2e7   :  { %390 = dma.vmem_to_hbm [thread:$0]  %s385_s9, 256, %s877_s7, [#allocation4], %s725_s13, %s725_s13, %s726_s14  }
 0x2e8   :  { %721 = dma.done.wait [#allocation4], 256  }
 0x2e9   :  { %722 = vsyncadd [#allocation4], 4294967040 }
 0x2ea   :  { %394 = vsyncpa [#allocation3], 1 }
 0x2eb   :  { %395 = vsyncpa [#allocation6], 1 }
 0x2ec   :  { %396 = vsyncpa [#allocation9], 1 }
 0x2ed   :  { %397 = vsyncpa [#allocation4], 1 }

</bundles_post_ra>
